<compile_context>
chip_gen: v7x
topology: tpu7x:2x2x1
jax: 0.10.0
libtpu: 0.0.40
codegen_flags: <defaults>
</compile_context>

<pallas_src>
import math

import jax
import jax.numpy as jnp
from jax import lax
from jax.experimental import pallas as pl
from jax.experimental.pallas import tpu as pltpu


def _round_up(a, b):
    return -(-a // b) * b


def _cdiv(a, b):
    return -(-a // b)


def _vmem_capacity_bytes():
    try:
        return int(pltpu.get_tpu_info().vmem_capacity_bytes)
    except Exception:
        return None


def multiclass_dice_loss(inp, tgt, weights=None):
    """Matches MulticlassDiceLoss.forward(input, target, weights).

    inp / tgt: (N, C, *spatial), tgt one-hot along C. Any float dtype; accumulation is f32.
    """
    assert inp.shape == tgt.shape
    N, C = int(inp.shape[0]), int(inp.shape[1])
    L = int(math.prod(inp.shape[2:])) if inp.ndim > 2 else 1
    R = N * C
    smooth = 1.0

    # Free reshapes of contiguous NCHW memory -- no transpose, no dtype cast, no padding in HBM.
    x = jnp.reshape(inp, (R, L))
    t = jnp.reshape(tgt, (R, L))
    itemsize = max(jnp.dtype(x.dtype).itemsize, jnp.dtype(t.dtype).itemsize)

    # ---- per-generation VMEM budget -------------------------------------------------------
    vmem_cap = _vmem_capacity_bytes()
    if vmem_cap is None:
        vmem_limit = 48 << 20                       # safe on every generation (v7x incl.)
    elif vmem_cap >= (100 << 20):
        vmem_limit = 96 << 20                       # v5e / v6e: 128 MiB physical
    else:
        vmem_limit = min(48 << 20, (vmem_cap * 3) // 4)   # v7x: 64 MiB physical

    # Bytes per streamed element per grid step: 2 inputs x 2 pipeline buffers in the input
    # dtype + ~3 f32 temporaries (upcast x, upcast t, product) in case the cast doesn't fuse.
    per_elem_bytes = 4 * itemsize + 12
    budget = vmem_limit - (2 << 20)                 # fixed margin

    # ---- tile selection ---------------------------------------------------------------------
    L128 = _round_up(L, 128)
    MAX_TR = 4096                                   # cap: keeps lane-padded (tr,128) scratch small

    if R <= MAX_TR and R * 128 * per_elem_bytes <= budget:
        tr = R                                      # whole row extent in one block
    else:
        tr = min(MAX_TR, max(8, ((budget // (128 * per_elem_bytes)) // 8) * 8))
    if R >= 16:
        # Prefer >= 2 row blocks so the "parallel" row axis can split across v7x's 2 TCs
        # (a no-op on single-core v5e/v6e beyond a negligible number of extra grid steps).
        tr = min(tr, _round_up(_cdiv(R, 2), 8))
    num_r = _cdiv(R, tr)

    # Row-dependent VMEM overhead: w block (double buffered) + 3 accumulators, lane-padded to 128.
    row_overhead = tr * 128 * 4 * (3 + 2)
    elems = max(tr * 128, (budget - row_overhead) // per_elem_bytes)
    tl = min(L128, max(128, ((elems // tr) // 128) * 128))
    num_l = _cdiv(L, tl)

    mask_lanes = (L % tl) != 0                      # ragged last L chunk
    mask_rows = (R % tr) != 0                       # ragged last row block

    # Per-row weight: row r = n*C + c -> weight[c] (ones when weights is None). Tiny (R_pad,1)
    # array; padded rows get weight 0 so they contribute exactly nothing.
    R_pad = num_r * tr
    w = jnp.ones((C,), jnp.float32) if weights is None else jnp.asarray(weights, jnp.float32)
    w_rows = jnp.tile(w, N)
    if R_pad > R:
        w_rows = jnp.pad(w_rows, (0, R_pad - R))
    w_rows = w_rows.reshape(R_pad, 1)

    inv_n = 1.0 / float(N)

    def kernel(w_ref, x_ref, t_ref, out_ref, inter_acc, xsum_acc, tsum_acc):
        ri = pl.program_id(0)
        li = pl.program_id(1)

        @pl.when(li == 0)
        def _init():
            inter_acc[...] = jnp.zeros_like(inter_acc)
            xsum_acc[...] = jnp.zeros_like(xsum_acc)
            tsum_acc[...] = jnp.zeros_like(tsum_acc)

        xv = x_ref[...].astype(jnp.float32)          # (tr, tl), sublane + lane dense
        tv = t_ref[...].astype(jnp.float32)

        # Ragged-edge masking (trace-time gated: emitted only when a dim doesn't divide).
        if mask_lanes or mask_rows:
            valid = None
            if mask_lanes:
                lane_ids = lax.broadcasted_iota(jnp.int32, (tr, tl), 1)
                valid = (li * tl + lane_ids) < L
            if mask_rows:
                row_ids = lax.broadcasted_iota(jnp.int32, (tr, tl), 0)
                rvalid = (ri * tr + row_ids) < R
                valid = rvalid if valid is None else (valid & rvalid)
            xv = jnp.where(valid, xv, 0.0)
            tv = jnp.where(valid, tv, 0.0)

        inter_acc[...] += jnp.sum(xv * tv, axis=1, keepdims=True)   # (tr, 1)
        xsum_acc[...] += jnp.sum(xv, axis=1, keepdims=True)
        tsum_acc[...] += jnp.sum(tv, axis=1, keepdims=True)

        @pl.when(li == pl.num_programs(1) - 1)
        def _finalize():
            dice = (2.0 * (inter_acc[...] + smooth)
                    / (xsum_acc[...] + tsum_acc[...] + smooth))     # (tr, 1) per (n, c) row
            # total loss = sum_c w_c * (1 - mean_n dice_{n,c}) = sum_r w_r * (1 - dice_r) / N
            out_ref[...] = w_ref[...] * (1.0 - dice) * inv_n

    out = pl.pallas_call(
        kernel,
        out_shape=jax.ShapeDtypeStruct((R_pad, 1), jnp.float32),
        grid=(num_r, num_l),
        in_specs=[
            pl.BlockSpec((tr, 1), lambda ri, li: (ri, 0)),          # per-row weights (resident)
            pl.BlockSpec((tr, tl), lambda ri, li: (ri, li)),        # prediction block
            pl.BlockSpec((tr, tl), lambda ri, li: (ri, li)),        # one-hot target block
        ],
        out_specs=pl.BlockSpec((tr, 1), lambda ri, li: (ri, 0)),    # written once per row block
        scratch_shapes=[pltpu.VMEM((tr, 1), jnp.float32)] * 3,
        compiler_params=pltpu.CompilerParams(
            dimension_semantics=("parallel", "arbitrary"),          # rows parallel, L reduction
            vmem_limit_bytes=vmem_limit,
        ),
    )(w_rows, x, t)

    return jnp.sum(out)                                             # padded rows contribute 0


def _reference(inp, tgt, weights=None):
    # Pure-JAX reference mirroring the PyTorch module exactly.
    N, C = inp.shape[0], inp.shape[1]
    total = jnp.float32(0.0)
    for i in range(C):
        xi = inp[:, i].reshape(N, -1).astype(jnp.float32)
        ti = tgt[:, i].reshape(N, -1).astype(jnp.float32)
        inter = jnp.sum(xi * ti, axis=1)
        loss = 2.0 * (inter + 1.0) / (jnp.sum(xi, axis=1) + jnp.sum(ti, axis=1) + 1.0)
        loss = 1.0 - jnp.sum(loss) / N
        if weights is not None:
            loss = loss * weights[i]
        total = total + loss
    return total


if __name__ == "__main__":
    key = jax.random.PRNGKey(0)
    k1, k2 = jax.random.split(key)

    N, C, H, W = 2, 4, 16, 16
    # predictions: softmax over channel axis (probability maps)
    logits = jax.random.normal(k1, (N, C, H, W), dtype=jnp.float32)
    inp = jax.nn.softmax(logits, axis=1)
    # target: one-hot encoded class map, channel axis = classes
    labels = jax.random.randint(k2, (N, H, W), 0, C)
    tgt = jnp.transpose(jax.nn.one_hot(labels, C, dtype=jnp.float32), (0, 3, 1, 2))

    loss = multiclass_dice_loss(inp, tgt)
    jax.block_until_ready(loss)
    ref = _reference(inp, tgt)
    assert jnp.allclose(loss, ref, atol=1e-5, rtol=1e-5), (loss, ref)

    wts = jnp.array([0.5, 1.0, 2.0, 0.25], jnp.float32)
    loss_w = multiclass_dice_loss(inp, tgt, weights=wts)
    jax.block_until_ready(loss_w)
    ref_w = _reference(inp, tgt, weights=wts)
    assert jnp.allclose(loss_w, ref_w, atol=1e-5, rtol=1e-5), (loss_w, ref_w)

    print("KERNEL_OK")
</pallas_src>

<mosaic_0001>
module attributes {stable_mosaic.version = 11 : i64} {
  func.func @kernel(%arg0: i32, %arg1: i32, %arg2: memref<8x1xf32, #tpu.memory_space<vmem>>, %arg3: memref<8x256xf32, #tpu.memory_space<vmem>>, %arg4: memref<8x256xf32, #tpu.memory_space<vmem>>, %arg5: memref<8x1xf32, #tpu.memory_space<vmem>>, %arg6: memref<8x1xf32, #tpu.memory_space<vmem>>, %arg7: memref<8x1xf32, #tpu.memory_space<vmem>>, %arg8: memref<8x1xf32, #tpu.memory_space<vmem>>) attributes {dimension_semantics = [#tpu.dimension_semantics<parallel>, #tpu.dimension_semantics<arbitrary>], iteration_bounds = array<i64: 1, 1>, scalar_prefetch = 0 : i64, scratch_operands = 3 : i64, tpu.core_type = #tpu.core_type<tc>, window_params = [{transform_indices = @transform_0, window_bounds = array<i64: 8, 1>}, {transform_indices = @transform_1, window_bounds = array<i64: 8, 256>}, {transform_indices = @transform_2, window_bounds = array<i64: 8, 256>}, {transform_indices = @transform_3, window_bounds = array<i64: 8, 1>}]} {
    %c0_i32 = arith.constant 0 : i32
    %0 = arith.cmpi eq, %arg1, %c0_i32 : i32
    %1 = arith.extui %0 : i1 to i32
    %c0_i32_0 = arith.constant 0 : i32
    %2 = arith.cmpi ne, %1, %c0_i32_0 : i32
    scf.if %2 {
      %cst_20 = arith.constant 0.000000e+00 : f32
      %24 = vector.broadcast %cst_20 : f32 to vector<8x1xf32>
      %c0_21 = arith.constant 0 : index
      %c0_22 = arith.constant 0 : index
      %25 = vector.load %arg6[%c0_21, %c0_22] : memref<8x1xf32, #tpu.memory_space<vmem>>, vector<8x1xf32>
      tpu.vector_store %arg6[%c0_21, %c0_22], %24 {strides = array<i32>} : memref<8x1xf32, #tpu.memory_space<vmem>>, vector<8x1xf32>,
      %cst_23 = arith.constant 0.000000e+00 : f32
      %26 = vector.broadcast %cst_23 : f32 to vector<8x1xf32>
      %c0_24 = arith.constant 0 : index
      %c0_25 = arith.constant 0 : index
      %27 = vector.load %arg7[%c0_24, %c0_25] : memref<8x1xf32, #tpu.memory_space<vmem>>, vector<8x1xf32>
      tpu.vector_store %arg7[%c0_24, %c0_25], %26 {strides = array<i32>} : memref<8x1xf32, #tpu.memory_space<vmem>>, vector<8x1xf32>,
      %cst_26 = arith.constant 0.000000e+00 : f32
      %28 = vector.broadcast %cst_26 : f32 to vector<8x1xf32>
      %c0_27 = arith.constant 0 : index
      %c0_28 = arith.constant 0 : index
      %29 = vector.load %arg8[%c0_27, %c0_28] : memref<8x1xf32, #tpu.memory_space<vmem>>, vector<8x1xf32>
      tpu.vector_store %arg8[%c0_27, %c0_28], %28 {strides = array<i32>} : memref<8x1xf32, #tpu.memory_space<vmem>>, vector<8x1xf32>,
    } else {
    }
    %c0 = arith.constant 0 : index
    %c0_1 = arith.constant 0 : index
    %3 = vector.load %arg3[%c0, %c0_1] : memref<8x256xf32, #tpu.memory_space<vmem>>, vector<8x256xf32>
    %c0_2 = arith.constant 0 : index
    %c0_3 = arith.constant 0 : index
    %4 = vector.load %arg4[%c0_2, %c0_3] : memref<8x256xf32, #tpu.memory_space<vmem>>, vector<8x256xf32>
    %c0_4 = arith.constant 0 : index
    %c0_5 = arith.constant 0 : index
    %5 = vector.load %arg6[%c0_4, %c0_5] : memref<8x1xf32, #tpu.memory_space<vmem>>, vector<8x1xf32>
    %6 = arith.mulf %3, %4 : vector<8x256xf32>
    %cst = arith.constant dense<0.000000e+00> : vector<8xf32>
    %7 = vector.multi_reduction <add>, %6, %cst [1] : vector<8x256xf32> to vector<8xf32>
    %8 = vector.shape_cast %7 : vector<8xf32> to vector<8x1xf32>
    %9 = arith.addf %5, %8 : vector<8x1xf32>
    %c0_6 = arith.constant 0 : index
    %c0_7 = arith.constant 0 : index
    %10 = vector.load %arg6[%c0_6, %c0_7] : memref<8x1xf32, #tpu.memory_space<vmem>>, vector<8x1xf32>
    tpu.vector_store %arg6[%c0_6, %c0_7], %9 {strides = array<i32>} : memref<8x1xf32, #tpu.memory_space<vmem>>, vector<8x1xf32>,
    %c0_8 = arith.constant 0 : index
    %c0_9 = arith.constant 0 : index
    %11 = vector.load %arg7[%c0_8, %c0_9] : memref<8x1xf32, #tpu.memory_space<vmem>>, vector<8x1xf32>
    %cst_10 = arith.constant dense<0.000000e+00> : vector<8xf32>
    %12 = vector.multi_reduction <add>, %3, %cst_10 [1] : vector<8x256xf32> to vector<8xf32>
    %13 = vector.shape_cast %12 : vector<8xf32> to vector<8x1xf32>
    %14 = arith.addf %11, %13 : vector<8x1xf32>
    %c0_11 = arith.constant 0 : index
    %c0_12 = arith.constant 0 : index
    %15 = vector.load %arg7[%c0_11, %c0_12] : memref<8x1xf32, #tpu.memory_space<vmem>>, vector<8x1xf32>
    tpu.vector_store %arg7[%c0_11, %c0_12], %14 {strides = array<i32>} : memref<8x1xf32, #tpu.memory_space<vmem>>, vector<8x1xf32>,
    %c0_13 = arith.constant 0 : index
    %c0_14 = arith.constant 0 : index
    %16 = vector.load %arg8[%c0_13, %c0_14] : memref<8x1xf32, #tpu.memory_space<vmem>>, vector<8x1xf32>
    %cst_15 = arith.constant dense<0.000000e+00> : vector<8xf32>
    %17 = vector.multi_reduction <add>, %4, %cst_15 [1] : vector<8x256xf32> to vector<8xf32>
    %18 = vector.shape_cast %17 : vector<8xf32> to vector<8x1xf32>
    %19 = arith.addf %16, %18 : vector<8x1xf32>
    %c0_16 = arith.constant 0 : index
    %c0_17 = arith.constant 0 : index
    %20 = vector.load %arg8[%c0_16, %c0_17] : memref<8x1xf32, #tpu.memory_space<vmem>>, vector<8x1xf32>
    tpu.vector_store %arg8[%c0_16, %c0_17], %19 {strides = array<i32>} : memref<8x1xf32, #tpu.memory_space<vmem>>, vector<8x1xf32>,
    %c0_i32_18 = arith.constant 0 : i32
    %21 = arith.cmpi eq, %arg1, %c0_i32_18 : i32
    %22 = arith.extui %21 : i1 to i32
    %c0_i32_19 = arith.constant 0 : i32
    %23 = arith.cmpi ne, %22, %c0_i32_19 : i32
    scf.if %23 {
      %c0_20 = arith.constant 0 : index
      %c0_21 = arith.constant 0 : index
      %24 = vector.load %arg6[%c0_20, %c0_21] : memref<8x1xf32, #tpu.memory_space<vmem>>, vector<8x1xf32>
      %cst_22 = arith.constant 1.000000e+00 : f32
      %25 = vector.broadcast %cst_22 : f32 to vector<8x1xf32>
      %26 = arith.addf %24, %25 : vector<8x1xf32>
      %cst_23 = arith.constant 2.000000e+00 : f32
      %27 = vector.broadcast %cst_23 : f32 to vector<8x1xf32>
      %28 = arith.mulf %27, %26 : vector<8x1xf32>
      %c0_24 = arith.constant 0 : index
      %c0_25 = arith.constant 0 : index
      %29 = vector.load %arg7[%c0_24, %c0_25] : memref<8x1xf32, #tpu.memory_space<vmem>>, vector<8x1xf32>
      %c0_26 = arith.constant 0 : index
      %c0_27 = arith.constant 0 : index
      %30 = vector.load %arg8[%c0_26, %c0_27] : memref<8x1xf32, #tpu.memory_space<vmem>>, vector<8x1xf32>
      %31 = arith.addf %29, %30 : vector<8x1xf32>
      %cst_28 = arith.constant 1.000000e+00 : f32
      %32 = vector.broadcast %cst_28 : f32 to vector<8x1xf32>
      %33 = arith.addf %31, %32 : vector<8x1xf32>
      %34 = arith.divf %28, %33 : vector<8x1xf32>
      %c0_29 = arith.constant 0 : index
      %c0_30 = arith.constant 0 : index
      %35 = vector.load %arg2[%c0_29, %c0_30] : memref<8x1xf32, #tpu.memory_space<vmem>>, vector<8x1xf32>
      %cst_31 = arith.constant 1.000000e+00 : f32
      %36 = vector.broadcast %cst_31 : f32 to vector<8x1xf32>
      %37 = arith.subf %36, %34 : vector<8x1xf32>
      %38 = arith.mulf %35, %37 : vector<8x1xf32>
      %cst_32 = arith.constant 5.000000e-01 : f32
      %39 = vector.broadcast %cst_32 : f32 to vector<8x1xf32>
      %40 = arith.mulf %38, %39 : vector<8x1xf32>
      %c0_33 = arith.constant 0 : index
      %c0_34 = arith.constant 0 : index
      %41 = vector.load %arg5[%c0_33, %c0_34] : memref<8x1xf32, #tpu.memory_space<vmem>>, vector<8x1xf32>
      tpu.vector_store %arg5[%c0_33, %c0_34], %40 {strides = array<i32>} : memref<8x1xf32, #tpu.memory_space<vmem>>, vector<8x1xf32>,
    } else {
    }
    return
  }
  func.func @transform_0(%arg0: i32, %arg1: i32) -> (i32, i32) {
    %c0_i32 = arith.constant 0 : i32
    %c0_i32_0 = arith.constant 0 : i32
    return %arg0, %c0_i32 : i32, i32
  }
  func.func @transform_1(%arg0: i32, %arg1: i32) -> (i32, i32) {
    %c0_i32 = arith.constant 0 : i32
    return %arg0, %arg1 : i32, i32
  }
  func.func @transform_2(%arg0: i32, %arg1: i32) -> (i32, i32) {
    %c0_i32 = arith.constant 0 : i32
    return %arg0, %arg1 : i32, i32
  }
  func.func @transform_3(%arg0: i32, %arg1: i32) -> (i32, i32) {
    %c0_i32 = arith.constant 0 : i32
    %c0_i32_0 = arith.constant 0 : i32
    return %arg0, %c0_i32 : i32, i32
  }
}

</mosaic_0001>

<bundles_post_ra>
// kernel: tpu_custom_call.1
= control target key start
LH: loop header
LB: loop body
LE: loop exit
PB: predicated region body
PF: predicated region fallthrough
CT: control target
= control target key end

     0   :  { %8 = vsyncpa [#allocation6], 0  ;;  %s109_s12 = smov [#allocation5]   ;;  %s162_s0 = inlined_call_operand.vmem [shape: f32[8,1], index: 0, kind: input, shape index: {}]   ;;  %s163_s1 = inlined_call_operand.hbm [shape: f32[8,256], index: 1, kind: input, shape index: {}]   ;;  %s164_s2 = inlined_call_operand.vmem [shape: f32[8,256], index: 2, kind: input, shape index: {}]   ;;  %s165_s3 = inlined_call_operand.vmem [shape: f32[8,1], index: 3, kind: output, shape index: {}]  }
   0x1   :  { %s17_s13 = sshll.u32 %s109_s12, 4  ;;  %s85_s16 = scalar_lea.hbm %s163_s1, 256  ;;  %s18_s13 = int_to_ptr.vmem [resolvable:$true] %s17_s13 }
   0x2   :  { %p86_p0 = scmp.ne.s32.totalorder %s163_s1, %s85_s16  ;;  %p89_p1 = scmp.lt.u32.totalorder %s85_s16, %s163_s1 }
   0x4   :  { %p91_p2 = pnand %p89_p1, %p86_p0 }
   0x6   :  { %94 = shalt.err (!%p91_p2)
}
   0x7   :  { %s95_s21 = scalar_lea.vmem %s18_s13, 256  ;;  %p100_p4 = scmp.lt.s32.totalorder %s18_s13, %s18_s13 }
   0x8   :  { %p96_p3 = scmp.ne.s32.totalorder %s18_s13, %s95_s21  ;;  %p101_p5 = scmp.lt.s32.totalorder %s95_s21, %s95_s21 }
   0xa   :  { %p102_p6 = por %p101_p5, %p100_p4 }
   0xc   :  { %p103_p7 = pnand %p102_p6, %p96_p3 }
   0xe   :  { %106 = shalt.err (!%p103_p7)
}
   0xf   :  { %20 = dma.hbm_to_vmem [thread:$0]  %s163_s1, 256, %s18_s13, [#allocation6]  }
  0x10   :  { %107 = dma.done.wait [#allocation6], 256  }
  0x11   :  { %108 = vsyncadd [#allocation6], 4294967040  ;;  %vm30_vm0 = vcmask 7168   ;;  %v110_v0 = vmov 0.0   ;;  %v34_v1 = vld [vmem:[#allocation5] sm:$0xff]  ;;  %v35_v2 = vld [vmem:[#allocation5 + $0x8] sm:$0xff] }
  0x12   :  { %32 = vst.msk [vmem:[#allocation3] sm:$0xff] %vm30_vm0, %v110_v0  ;;  %31 = vst.msk [vmem:[#allocation2] sm:$0xff] %vm30_vm0, %v110_v0  ;;  %v36_v3 = vld [vmem:[%s164_s2] sm:$0xff]  ;;  %v48_v4 = vadd.f32 %v35_v2, %v34_v1  ;;  %v37_v5 = vld [vmem:[%s164_s2 + $0x8] sm:$0xff] }
  0x13   :  { %33 = vst.msk [vmem:[#allocation4] sm:$0xff] %vm30_vm0, %v110_v0  ;;  %v39_v6 = vmul.f32 %v36_v3, %v34_v1  ;;  %v40_v7 = vmul.f32 %v37_v5, %v35_v2  ;;  %v54_v8 = vadd.f32 %v37_v5, %v36_v3  ;;  %v71_v28 = vld [vmem:[%s162_s0] sm:$0xff] }
  0x14   :  { %49 = vadd.xlane.f32.xlu0 %v48_v4 }
  0x15   :  { %v41_v9 = vadd.f32 %v40_v7, %v39_v6 }
  0x17   :  { %42 = vadd.xlane.f32.xlu1 %v41_v9 }
  0x18   :  { %55 = vadd.xlane.f32.xlu0 %v54_v8 }
  0x19   :  { %v47_v10 = vld [vmem:[#allocation3] sm:$0xff]  ;;  %v38_v13 = vld [vmem:[#allocation2] sm:$0xff] }
  0x1a   :  { %v53_v14 = vld [vmem:[#allocation4] sm:$0xff] }
  0xa1   :  { %v50_v11 = vpop.xlane.xlu0 %49 }
  0xa2   :  { %v51_v12 = vadd.f32 %v50_v11, %v47_v10 }
  0xa4   :  { %52 = vst.msk [vmem:[#allocation3] sm:$0xff] %vm30_vm0, %v51_v12  ;;  %v43_v15 = vpop.xlane.xlu1 %42 }
  0xa5   :  { %v56_v16 = vpop.xlane.xlu0 %55  ;;  %v44_v17 = vadd.f32 %v43_v15, %v38_v13 }
  0xa6   :  { %v57_v18 = vadd.f32 %v56_v16, %v53_v14 }
  0xa7   :  { %46 = vst.msk [vmem:[#allocation2] sm:$0xff] %vm30_vm0, %v44_v17 }
  0xa8   :  { %58 = vst.msk [vmem:[#allocation4] sm:$0xff] %vm30_vm0, %v57_v18 }
  0xab   :  { %v65_v19 = vld [vmem:[#allocation3] sm:$0xff] }
  0xae   :  { %v62_v23 = vld [vmem:[#allocation2] sm:$0xff] }
  0xaf   :  { %v66_v20 = vld [vmem:[#allocation4] sm:$0xff]  ;;  %v63_v24 = vadd.f32 1.0, %v62_v23 }
  0xb0   :  { %v67_v21 = vadd.f32 %v66_v20, %v65_v19 }
  0xb1   :  { %v64_v25 = vmul.f32 2.0, %v63_v24 }
  0xb2   :  { %v68_v22 = vadd.f32 1.0, %v67_v21 }
  0xb4   :  { %83 = vrcp.f32 %v68_v22 }
  0xbe   :  { %v84_v26 = vpop.eup %83 }
  0xbf   :  { %v70_v27 = vmul.f32 %v84_v26, %v64_v25 }
  0xc1   :  { %v72_v29 = vsub.f32 1.0, %v70_v27 }
  0xc3   :  { %v73_v30 = vmul.f32 %v72_v29, %v71_v28 }
  0xc5   :  { %v74_v31 = vmul.f32 0.5, %v73_v30 }
  0xc7   :  { %75 = vst.msk [vmem:[%s165_s3] sm:$0xff] %vm30_vm0, %v74_v31 }
  0xc8   :  { %80 = vsyncpa [#allocation6], 1 }

</bundles_post_ra>
